<compile_context>
chip_gen: v7x
topology: tpu7x:2x2x1
jax: 0.10.0
libtpu: 0.0.40
codegen_flags: <defaults>
</compile_context>

<pallas_src>
import jax
import jax.numpy as jnp
from jax.experimental import pallas as pl


def _mish(z):
    # mish(z) = z * tanh(softplus(z)).
    # Single-transcendental form: tanh(log1p(e^z)) = n / (n + 2) with
    # n = e^z * (e^z + 2).  e^z is clamped at z=20 (beyond which
    # tanh(softplus(z)) == 1 in f32) and that branch is selected with where.
    e = jnp.exp(jnp.minimum(z, 20.0))
    n = e * (e + 2.0)
    t = n / (n + 2.0)  # exact divide keeps tight parity with the f32 reference;
    # swap in 1 - 2*pl.reciprocal(n + 2.0, approx=True) only if EUP ever binds.
    return z * jnp.where(z > 20.0, 1.0, t)


def _critic_fused_kernel(s_ref, a_ref,
                         w1s_ref, w1a_ref, b1_ref,
                         w2_ref, b2_ref,
                         w3_ref, b3_ref,
                         w4_ref, b4_ref,
                         out_ref):
    """Single invocation: both Q heads, all four layers, one [2, B] writeback."""
    s = s_ref[...].astype(jnp.bfloat16)          # [B, obs_dim]
    a = a_ref[...].astype(jnp.bfloat16)          # [B, act_dim]

    for h in range(2):                           # static unroll over the 2 heads
        # Layer 1: split-W1 dual matmul replaces concat([state, action]) @ W1.
        z = (jnp.dot(s, w1s_ref[h], preferred_element_type=jnp.float32)
             + jnp.dot(a, w1a_ref[h], preferred_element_type=jnp.float32)
             + b1_ref[h])
        x = _mish(z)
        x = _mish(jnp.dot(x.astype(jnp.bfloat16), w2_ref[h],
                          preferred_element_type=jnp.float32) + b2_ref[h])
        x = _mish(jnp.dot(x.astype(jnp.bfloat16), w3_ref[h],
                          preferred_element_type=jnp.float32) + b3_ref[h])
        # Final N=1 layer: VPU multiply + XLU lane reduction instead of a
        # 1-column MXU matmul (which would use 1/256 of the MXU columns).
        w4_row = w4_ref[h].astype(jnp.float32)                       # [1, 256]
        q = jnp.sum(x * w4_row, axis=-1, keepdims=True) + b4_ref[h]  # [B, 1] f32
        # TODO(synk): at large B compute this layer transposed so q lands as
        # [1, B] lane-dense without this tiny sublane->lane relayout.
        out_ref[h, :] = q[:, 0]


@jax.jit
def critic_forward(state, action, packed_params):
    """packed_params: 9-tuple of head-stacked arrays (see pack_critic_params)."""
    B = state.shape[0]
    out = pl.pallas_call(
        _critic_fused_kernel,
        out_shape=jax.ShapeDtypeStruct((2, B), jnp.float32),
        # No grid: every operand is a whole-array VMEM block (default specs);
        # both heads run inside one launch.
    )(state, action, *packed_params)
    return out[0][:, None], out[1][:, None]


def pack_critic_params(q1_params, q2_params, obs_dim):
    """Prepare/stack per-head params for the fused kernel (done once, off-path).

    Input per head: (w1 [d_in,256], b1 [1,256], w2, b2, w3, b3, w4 [256,1], b4 [1,1]).
    Output: 9-tuple (w1_s, w1_a, b1, w2, b2, w3, b3, w4_row, b4), each with a
    leading head axis of size 2.  Weights are cast to bf16 (biases kept f32);
    W1 is split into state/action halves; W4 is stored as a [1, 256] row.
    """
    def prep(p):
        w1, b1, w2, b2, w3, b3, w4, b4 = p
        bf = lambda w: w.astype(jnp.bfloat16)
        return (bf(w1[:obs_dim]),   # W1 state half   [obs, 256]
                bf(w1[obs_dim:]),   # W1 action half  [act, 256]
                b1,                 # biases stay f32 (tiny bytes, full precision adds)
                bf(w2), b2,
                bf(w3), b3,
                bf(w4.T),           # final layer as a row [1, 256]
                b4)

    h1, h2 = prep(q1_params), prep(q2_params)
    return tuple(jnp.stack([x, y], axis=0) for x, y in zip(h1, h2))


def init_critic_params(key, obs_dim, act_dim, hidden_dim=256):
    """Deterministic synthetic init mimicking the module's layer shapes (f32 master)."""
    d_in = obs_dim + act_dim
    dims = [(d_in, hidden_dim), (hidden_dim, hidden_dim),
            (hidden_dim, hidden_dim), (hidden_dim, 1)]

    def one_head(k):
        params = []
        for (fan_in, fan_out) in dims:
            k, kw, kb = jax.random.split(k, 3)
            bound = 1.0 / jnp.sqrt(fan_in)
            w = jax.random.uniform(kw, (fan_in, fan_out), jnp.float32,
                                   minval=-bound, maxval=bound)
            b = jax.random.uniform(kb, (1, fan_out), jnp.float32,
                                   minval=-bound, maxval=bound)
            params += [w, b]
        return tuple(params)

    k1, k2 = jax.random.split(key)
    return one_head(k1), one_head(k2)


if __name__ == "__main__":
    # Small, MuJoCo-like dims: obs_dim=17, act_dim=6 (e.g. HalfCheetah).
    batch, obs_dim, act_dim = 8, 17, 6

    key = jax.random.PRNGKey(0)
    k_params, k_state, k_action = jax.random.split(key, 3)

    q1_params, q2_params = init_critic_params(k_params, obs_dim, act_dim)
    packed = pack_critic_params(q1_params, q2_params, obs_dim)

    state = jax.random.normal(k_state, (batch, obs_dim), jnp.float32)
    action = jax.random.normal(k_action, (batch, act_dim), jnp.float32)

    q1, q2 = critic_forward(state, action, packed)
    jax.block_until_ready((q1, q2))

    # Pure-JAX f32 reference of the original module's math (torch-parity).
    def ref_head(x, p):
        w1, b1, w2, b2, w3, b3, w4, b4 = p
        mish = lambda z: z * jnp.tanh(jax.nn.softplus(z))
        h = mish(x @ w1 + b1)
        h = mish(h @ w2 + b2)
        h = mish(h @ w3 + b3)
        return h @ w4 + b4

    x = jnp.concatenate([state, action], axis=-1)
    r1 = ref_head(x, q1_params)
    r2 = ref_head(x, q2_params)
    assert q1.shape == (batch, 1) and q2.shape == (batch, 1)
    # bf16 weight/activation storage in the kernel -> tolerance loosened vs the
    # pure-f32 reference (observed error is ~1e-3 at these shapes).
    assert jnp.allclose(q1, r1, atol=2e-2, rtol=2e-2)
    assert jnp.allclose(q2, r2, atol=2e-2, rtol=2e-2)

    print("KERNEL_OK")
</pallas_src>

<mosaic_0001>
module attributes {stable_mosaic.version = 11 : i64} {
  func.func @_critic_fused_kernel(%arg0: memref<8x17xf32, #tpu.memory_space<vmem>>, %arg1: memref<8x6xf32, #tpu.memory_space<vmem>>, %arg2: memref<2x17x256xbf16, #tpu.memory_space<vmem>>, %arg3: memref<2x6x256xbf16, #tpu.memory_space<vmem>>, %arg4: memref<2x1x256xf32, #tpu.memory_space<vmem>>, %arg5: memref<2x256x256xbf16, #tpu.memory_space<vmem>>, %arg6: memref<2x1x256xf32, #tpu.memory_space<vmem>>, %arg7: memref<2x256x256xbf16, #tpu.memory_space<vmem>>, %arg8: memref<2x1x256xf32, #tpu.memory_space<vmem>>, %arg9: memref<2x1x256xbf16, #tpu.memory_space<vmem>>, %arg10: memref<2x1x1xf32, #tpu.memory_space<vmem>>, %arg11: memref<2x8xf32, #tpu.memory_space<vmem>>) attributes {dimension_semantics = [], scalar_prefetch = 0 : i64, scratch_operands = 0 : i64, tpu.core_type = #tpu.core_type<tc>} {
    %c0 = arith.constant 0 : index
    %c0_0 = arith.constant 0 : index
    %0 = vector.load %arg0[%c0, %c0_0] : memref<8x17xf32, #tpu.memory_space<vmem>>, vector<8x17xf32>
    %1 = arith.truncf %0 : vector<8x17xf32> to vector<8x17xbf16>
    %c0_1 = arith.constant 0 : index
    %c0_2 = arith.constant 0 : index
    %2 = vector.load %arg1[%c0_1, %c0_2] : memref<8x6xf32, #tpu.memory_space<vmem>>, vector<8x6xf32>
    %3 = arith.truncf %2 : vector<8x6xf32> to vector<8x6xbf16>
    %c0_3 = arith.constant 0 : index
    %c0_4 = arith.constant 0 : index
    %c0_5 = arith.constant 0 : index
    %4 = vector.load %arg2[%c0_3, %c0_4, %c0_5] : memref<2x17x256xbf16, #tpu.memory_space<vmem>>, vector<1x17x256xbf16>
    %5 = vector.shape_cast %4 : vector<1x17x256xbf16> to vector<17x256xbf16>
    %cst = arith.constant dense<0.000000e+00> : vector<8x256xf32>
    %6 = tpu.matmul %1, %5, %cst {dimension_numbers = #tpu.dot_dimension_numbers<[1], [0], [0], [1], [0, 0, 1, 1], [], []>} : vector<8x17xbf16>, vector<17x256xbf16>, vector<8x256xf32> -> vector<8x256xf32>
    %c0_6 = arith.constant 0 : index
    %c0_7 = arith.constant 0 : index
    %c0_8 = arith.constant 0 : index
    %7 = vector.load %arg3[%c0_6, %c0_7, %c0_8] : memref<2x6x256xbf16, #tpu.memory_space<vmem>>, vector<1x6x256xbf16>
    %8 = vector.shape_cast %7 : vector<1x6x256xbf16> to vector<6x256xbf16>
    %cst_9 = arith.constant dense<0.000000e+00> : vector<8x256xf32>
    %9 = tpu.matmul %3, %8, %cst_9 {dimension_numbers = #tpu.dot_dimension_numbers<[1], [0], [0], [1], [0, 0, 1, 1], [], []>} : vector<8x6xbf16>, vector<6x256xbf16>, vector<8x256xf32> -> vector<8x256xf32>
    %10 = arith.addf %6, %9 : vector<8x256xf32>
    %c0_10 = arith.constant 0 : index
    %c0_11 = arith.constant 0 : index
    %c0_12 = arith.constant 0 : index
    %11 = vector.load %arg4[%c0_10, %c0_11, %c0_12] : memref<2x1x256xf32, #tpu.memory_space<vmem>>, vector<1x1x256xf32>
    %12 = vector.shape_cast %11 : vector<1x1x256xf32> to vector<1x256xf32>
    %13 = vector.broadcast %12 : vector<1x256xf32> to vector<8x256xf32>
    %14 = arith.addf %10, %13 : vector<8x256xf32>
    %cst_13 = arith.constant 2.000000e+01 : f32
    %15 = vector.broadcast %cst_13 : f32 to vector<8x256xf32>
    %16 = arith.minimumf %14, %15 : vector<8x256xf32>
    %17 = math.exp %16 : vector<8x256xf32>
    %cst_14 = arith.constant 2.000000e+00 : f32
    %18 = vector.broadcast %cst_14 : f32 to vector<8x256xf32>
    %19 = arith.addf %17, %18 : vector<8x256xf32>
    %20 = arith.mulf %17, %19 : vector<8x256xf32>
    %cst_15 = arith.constant 2.000000e+00 : f32
    %21 = vector.broadcast %cst_15 : f32 to vector<8x256xf32>
    %22 = arith.addf %20, %21 : vector<8x256xf32>
    %23 = arith.divf %20, %22 : vector<8x256xf32>
    %cst_16 = arith.constant 2.000000e+01 : f32
    %24 = vector.broadcast %cst_16 : f32 to vector<8x256xf32>
    %25 = arith.cmpf ogt, %14, %24 : vector<8x256xf32>
    %cst_17 = arith.constant 1.000000e+00 : f32
    %26 = vector.broadcast %cst_17 : f32 to vector<8x256xf32>
    %27 = arith.select %25, %26, %23 : vector<8x256xi1>, vector<8x256xf32>
    %28 = arith.mulf %14, %27 : vector<8x256xf32>
    %29 = arith.truncf %28 : vector<8x256xf32> to vector<8x256xbf16>
    %c0_18 = arith.constant 0 : index
    %c0_19 = arith.constant 0 : index
    %c0_20 = arith.constant 0 : index
    %30 = vector.load %arg5[%c0_18, %c0_19, %c0_20] : memref<2x256x256xbf16, #tpu.memory_space<vmem>>, vector<1x256x256xbf16>
    %31 = vector.shape_cast %30 : vector<1x256x256xbf16> to vector<256x256xbf16>
    %cst_21 = arith.constant dense<0.000000e+00> : vector<8x256xf32>
    %32 = tpu.matmul %29, %31, %cst_21 {dimension_numbers = #tpu.dot_dimension_numbers<[1], [0], [0], [1], [0, 0, 1, 1], [], []>} : vector<8x256xbf16>, vector<256x256xbf16>, vector<8x256xf32> -> vector<8x256xf32>
    %c0_22 = arith.constant 0 : index
    %c0_23 = arith.constant 0 : index
    %c0_24 = arith.constant 0 : index
    %33 = vector.load %arg6[%c0_22, %c0_23, %c0_24] : memref<2x1x256xf32, #tpu.memory_space<vmem>>, vector<1x1x256xf32>
    %34 = vector.shape_cast %33 : vector<1x1x256xf32> to vector<1x256xf32>
    %35 = vector.broadcast %34 : vector<1x256xf32> to vector<8x256xf32>
    %36 = arith.addf %32, %35 : vector<8x256xf32>
    %cst_25 = arith.constant 2.000000e+01 : f32
    %37 = vector.broadcast %cst_25 : f32 to vector<8x256xf32>
    %38 = arith.minimumf %36, %37 : vector<8x256xf32>
    %39 = math.exp %38 : vector<8x256xf32>
    %cst_26 = arith.constant 2.000000e+00 : f32
    %40 = vector.broadcast %cst_26 : f32 to vector<8x256xf32>
    %41 = arith.addf %39, %40 : vector<8x256xf32>
    %42 = arith.mulf %39, %41 : vector<8x256xf32>
    %cst_27 = arith.constant 2.000000e+00 : f32
    %43 = vector.broadcast %cst_27 : f32 to vector<8x256xf32>
    %44 = arith.addf %42, %43 : vector<8x256xf32>
    %45 = arith.divf %42, %44 : vector<8x256xf32>
    %cst_28 = arith.constant 2.000000e+01 : f32
    %46 = vector.broadcast %cst_28 : f32 to vector<8x256xf32>
    %47 = arith.cmpf ogt, %36, %46 : vector<8x256xf32>
    %cst_29 = arith.constant 1.000000e+00 : f32
    %48 = vector.broadcast %cst_29 : f32 to vector<8x256xf32>
    %49 = arith.select %47, %48, %45 : vector<8x256xi1>, vector<8x256xf32>
    %50 = arith.mulf %36, %49 : vector<8x256xf32>
    %51 = arith.truncf %50 : vector<8x256xf32> to vector<8x256xbf16>
    %c0_30 = arith.constant 0 : index
    %c0_31 = arith.constant 0 : index
    %c0_32 = arith.constant 0 : index
    %52 = vector.load %arg7[%c0_30, %c0_31, %c0_32] : memref<2x256x256xbf16, #tpu.memory_space<vmem>>, vector<1x256x256xbf16>
    %53 = vector.shape_cast %52 : vector<1x256x256xbf16> to vector<256x256xbf16>
    %cst_33 = arith.constant dense<0.000000e+00> : vector<8x256xf32>
    %54 = tpu.matmul %51, %53, %cst_33 {dimension_numbers = #tpu.dot_dimension_numbers<[1], [0], [0], [1], [0, 0, 1, 1], [], []>} : vector<8x256xbf16>, vector<256x256xbf16>, vector<8x256xf32> -> vector<8x256xf32>
    %c0_34 = arith.constant 0 : index
    %c0_35 = arith.constant 0 : index
    %c0_36 = arith.constant 0 : index
    %55 = vector.load %arg8[%c0_34, %c0_35, %c0_36] : memref<2x1x256xf32, #tpu.memory_space<vmem>>, vector<1x1x256xf32>
    %56 = vector.shape_cast %55 : vector<1x1x256xf32> to vector<1x256xf32>
    %57 = vector.broadcast %56 : vector<1x256xf32> to vector<8x256xf32>
    %58 = arith.addf %54, %57 : vector<8x256xf32>
    %cst_37 = arith.constant 2.000000e+01 : f32
    %59 = vector.broadcast %cst_37 : f32 to vector<8x256xf32>
    %60 = arith.minimumf %58, %59 : vector<8x256xf32>
    %61 = math.exp %60 : vector<8x256xf32>
    %cst_38 = arith.constant 2.000000e+00 : f32
    %62 = vector.broadcast %cst_38 : f32 to vector<8x256xf32>
    %63 = arith.addf %61, %62 : vector<8x256xf32>
    %64 = arith.mulf %61, %63 : vector<8x256xf32>
    %cst_39 = arith.constant 2.000000e+00 : f32
    %65 = vector.broadcast %cst_39 : f32 to vector<8x256xf32>
    %66 = arith.addf %64, %65 : vector<8x256xf32>
    %67 = arith.divf %64, %66 : vector<8x256xf32>
    %cst_40 = arith.constant 2.000000e+01 : f32
    %68 = vector.broadcast %cst_40 : f32 to vector<8x256xf32>
    %69 = arith.cmpf ogt, %58, %68 : vector<8x256xf32>
    %cst_41 = arith.constant 1.000000e+00 : f32
    %70 = vector.broadcast %cst_41 : f32 to vector<8x256xf32>
    %71 = arith.select %69, %70, %67 : vector<8x256xi1>, vector<8x256xf32>
    %72 = arith.mulf %58, %71 : vector<8x256xf32>
    %c0_42 = arith.constant 0 : index
    %c0_43 = arith.constant 0 : index
    %c0_44 = arith.constant 0 : index
    %73 = vector.load %arg9[%c0_42, %c0_43, %c0_44] : memref<2x1x256xbf16, #tpu.memory_space<vmem>>, vector<1x1x256xbf16>
    %74 = vector.shape_cast %73 : vector<1x1x256xbf16> to vector<1x256xbf16>
    %75 = arith.extf %74 : vector<1x256xbf16> to vector<1x256xf32>
    %76 = vector.broadcast %75 : vector<1x256xf32> to vector<8x256xf32>
    %77 = arith.mulf %72, %76 : vector<8x256xf32>
    %cst_45 = arith.constant dense<0.000000e+00> : vector<8xf32>
    %78 = vector.multi_reduction <add>, %77, %cst_45 [1] : vector<8x256xf32> to vector<8xf32>
    %79 = vector.shape_cast %78 : vector<8xf32> to vector<8x1xf32>
    %c0_46 = arith.constant 0 : index
    %c0_47 = arith.constant 0 : index
    %c0_48 = arith.constant 0 : index
    %80 = vector.load %arg10[%c0_46, %c0_47, %c0_48] : memref<2x1x1xf32, #tpu.memory_space<vmem>>, vector<1x1x1xf32>
    %81 = vector.shape_cast %80 : vector<1x1x1xf32> to vector<1x1xf32>
    %82 = vector.broadcast %81 : vector<1x1xf32> to vector<8x1xf32>
    %83 = arith.addf %79, %82 : vector<8x1xf32>
    %84 = vector.shape_cast %83 : vector<8x1xf32> to vector<8xf32>
    %c0_49 = arith.constant 0 : index
    %c0_50 = arith.constant 0 : index
    %85 = vector.load %arg11[%c0_49, %c0_50] : memref<2x8xf32, #tpu.memory_space<vmem>>, vector<1x8xf32>
    %86 = vector.shape_cast %85 : vector<1x8xf32> to vector<8xf32>
    %87 = vector.shape_cast %84 : vector<8xf32> to vector<1x8xf32>
    tpu.vector_store %arg11[%c0_49, %c0_50], %87 {strides = array<i32>} : memref<2x8xf32, #tpu.memory_space<vmem>>, vector<1x8xf32>,
    %c1 = arith.constant 1 : index
    %c0_51 = arith.constant 0 : index
    %c0_52 = arith.constant 0 : index
    %88 = vector.load %arg2[%c1, %c0_51, %c0_52] : memref<2x17x256xbf16, #tpu.memory_space<vmem>>, vector<1x17x256xbf16>
    %89 = vector.shape_cast %88 : vector<1x17x256xbf16> to vector<17x256xbf16>
    %cst_53 = arith.constant dense<0.000000e+00> : vector<8x256xf32>
    %90 = tpu.matmul %1, %89, %cst_53 {dimension_numbers = #tpu.dot_dimension_numbers<[1], [0], [0], [1], [0, 0, 1, 1], [], []>} : vector<8x17xbf16>, vector<17x256xbf16>, vector<8x256xf32> -> vector<8x256xf32>
    %c1_54 = arith.constant 1 : index
    %c0_55 = arith.constant 0 : index
    %c0_56 = arith.constant 0 : index
    %91 = vector.load %arg3[%c1_54, %c0_55, %c0_56] : memref<2x6x256xbf16, #tpu.memory_space<vmem>>, vector<1x6x256xbf16>
    %92 = vector.shape_cast %91 : vector<1x6x256xbf16> to vector<6x256xbf16>
    %cst_57 = arith.constant dense<0.000000e+00> : vector<8x256xf32>
    %93 = tpu.matmul %3, %92, %cst_57 {dimension_numbers = #tpu.dot_dimension_numbers<[1], [0], [0], [1], [0, 0, 1, 1], [], []>} : vector<8x6xbf16>, vector<6x256xbf16>, vector<8x256xf32> -> vector<8x256xf32>
    %94 = arith.addf %90, %93 : vector<8x256xf32>
    %c1_58 = arith.constant 1 : index
    %c0_59 = arith.constant 0 : index
    %c0_60 = arith.constant 0 : index
    %95 = vector.load %arg4[%c1_58, %c0_59, %c0_60] : memref<2x1x256xf32, #tpu.memory_space<vmem>>, vector<1x1x256xf32>
    %96 = vector.shape_cast %95 : vector<1x1x256xf32> to vector<1x256xf32>
    %97 = vector.broadcast %96 : vector<1x256xf32> to vector<8x256xf32>
    %98 = arith.addf %94, %97 : vector<8x256xf32>
    %cst_61 = arith.constant 2.000000e+01 : f32
    %99 = vector.broadcast %cst_61 : f32 to vector<8x256xf32>
    %100 = arith.minimumf %98, %99 : vector<8x256xf32>
    %101 = math.exp %100 : vector<8x256xf32>
    %cst_62 = arith.constant 2.000000e+00 : f32
    %102 = vector.broadcast %cst_62 : f32 to vector<8x256xf32>
    %103 = arith.addf %101, %102 : vector<8x256xf32>
    %104 = arith.mulf %101, %103 : vector<8x256xf32>
    %cst_63 = arith.constant 2.000000e+00 : f32
    %105 = vector.broadcast %cst_63 : f32 to vector<8x256xf32>
    %106 = arith.addf %104, %105 : vector<8x256xf32>
    %107 = arith.divf %104, %106 : vector<8x256xf32>
    %cst_64 = arith.constant 2.000000e+01 : f32
    %108 = vector.broadcast %cst_64 : f32 to vector<8x256xf32>
    %109 = arith.cmpf ogt, %98, %108 : vector<8x256xf32>
    %cst_65 = arith.constant 1.000000e+00 : f32
    %110 = vector.broadcast %cst_65 : f32 to vector<8x256xf32>
    %111 = arith.select %109, %110, %107 : vector<8x256xi1>, vector<8x256xf32>
    %112 = arith.mulf %98, %111 : vector<8x256xf32>
    %113 = arith.truncf %112 : vector<8x256xf32> to vector<8x256xbf16>
    %c1_66 = arith.constant 1 : index
    %c0_67 = arith.constant 0 : index
    %c0_68 = arith.constant 0 : index
    %114 = vector.load %arg5[%c1_66, %c0_67, %c0_68] : memref<2x256x256xbf16, #tpu.memory_space<vmem>>, vector<1x256x256xbf16>
    %115 = vector.shape_cast %114 : vector<1x256x256xbf16> to vector<256x256xbf16>
    %cst_69 = arith.constant dense<0.000000e+00> : vector<8x256xf32>
    %116 = tpu.matmul %113, %115, %cst_69 {dimension_numbers = #tpu.dot_dimension_numbers<[1], [0], [0], [1], [0, 0, 1, 1], [], []>} : vector<8x256xbf16>, vector<256x256xbf16>, vector<8x256xf32> -> vector<8x256xf32>
    %c1_70 = arith.constant 1 : index
    %c0_71 = arith.constant 0 : index
    %c0_72 = arith.constant 0 : index
    %117 = vector.load %arg6[%c1_70, %c0_71, %c0_72] : memref<2x1x256xf32, #tpu.memory_space<vmem>>, vector<1x1x256xf32>
    %118 = vector.shape_cast %117 : vector<1x1x256xf32> to vector<1x256xf32>
    %119 = vector.broadcast %118 : vector<1x256xf32> to vector<8x256xf32>
    %120 = arith.addf %116, %119 : vector<8x256xf32>
    %cst_73 = arith.constant 2.000000e+01 : f32
    %121 = vector.broadcast %cst_73 : f32 to vector<8x256xf32>
    %122 = arith.minimumf %120, %121 : vector<8x256xf32>
    %123 = math.exp %122 : vector<8x256xf32>
    %cst_74 = arith.constant 2.000000e+00 : f32
    %124 = vector.broadcast %cst_74 : f32 to vector<8x256xf32>
    %125 = arith.addf %123, %124 : vector<8x256xf32>
    %126 = arith.mulf %123, %125 : vector<8x256xf32>
    %cst_75 = arith.constant 2.000000e+00 : f32
    %127 = vector.broadcast %cst_75 : f32 to vector<8x256xf32>
    %128 = arith.addf %126, %127 : vector<8x256xf32>
    %129 = arith.divf %126, %128 : vector<8x256xf32>
    %cst_76 = arith.constant 2.000000e+01 : f32
    %130 = vector.broadcast %cst_76 : f32 to vector<8x256xf32>
    %131 = arith.cmpf ogt, %120, %130 : vector<8x256xf32>
    %cst_77 = arith.constant 1.000000e+00 : f32
    %132 = vector.broadcast %cst_77 : f32 to vector<8x256xf32>
    %133 = arith.select %131, %132, %129 : vector<8x256xi1>, vector<8x256xf32>
    %134 = arith.mulf %120, %133 : vector<8x256xf32>
    %135 = arith.truncf %134 : vector<8x256xf32> to vector<8x256xbf16>
    %c1_78 = arith.constant 1 : index
    %c0_79 = arith.constant 0 : index
    %c0_80 = arith.constant 0 : index
    %136 = vector.load %arg7[%c1_78, %c0_79, %c0_80] : memref<2x256x256xbf16, #tpu.memory_space<vmem>>, vector<1x256x256xbf16>
    %137 = vector.shape_cast %136 : vector<1x256x256xbf16> to vector<256x256xbf16>
    %cst_81 = arith.constant dense<0.000000e+00> : vector<8x256xf32>
    %138 = tpu.matmul %135, %137, %cst_81 {dimension_numbers = #tpu.dot_dimension_numbers<[1], [0], [0], [1], [0, 0, 1, 1], [], []>} : vector<8x256xbf16>, vector<256x256xbf16>, vector<8x256xf32> -> vector<8x256xf32>
    %c1_82 = arith.constant 1 : index
    %c0_83 = arith.constant 0 : index
    %c0_84 = arith.constant 0 : index
    %139 = vector.load %arg8[%c1_82, %c0_83, %c0_84] : memref<2x1x256xf32, #tpu.memory_space<vmem>>, vector<1x1x256xf32>
    %140 = vector.shape_cast %139 : vector<1x1x256xf32> to vector<1x256xf32>
    %141 = vector.broadcast %140 : vector<1x256xf32> to vector<8x256xf32>
    %142 = arith.addf %138, %141 : vector<8x256xf32>
    %cst_85 = arith.constant 2.000000e+01 : f32
    %143 = vector.broadcast %cst_85 : f32 to vector<8x256xf32>
    %144 = arith.minimumf %142, %143 : vector<8x256xf32>
    %145 = math.exp %144 : vector<8x256xf32>
    %cst_86 = arith.constant 2.000000e+00 : f32
    %146 = vector.broadcast %cst_86 : f32 to vector<8x256xf32>
    %147 = arith.addf %145, %146 : vector<8x256xf32>
    %148 = arith.mulf %145, %147 : vector<8x256xf32>
    %cst_87 = arith.constant 2.000000e+00 : f32
    %149 = vector.broadcast %cst_87 : f32 to vector<8x256xf32>
    %150 = arith.addf %148, %149 : vector<8x256xf32>
    %151 = arith.divf %148, %150 : vector<8x256xf32>
    %cst_88 = arith.constant 2.000000e+01 : f32
    %152 = vector.broadcast %cst_88 : f32 to vector<8x256xf32>
    %153 = arith.cmpf ogt, %142, %152 : vector<8x256xf32>
    %cst_89 = arith.constant 1.000000e+00 : f32
    %154 = vector.broadcast %cst_89 : f32 to vector<8x256xf32>
    %155 = arith.select %153, %154, %151 : vector<8x256xi1>, vector<8x256xf32>
    %156 = arith.mulf %142, %155 : vector<8x256xf32>
    %c1_90 = arith.constant 1 : index
    %c0_91 = arith.constant 0 : index
    %c0_92 = arith.constant 0 : index
    %157 = vector.load %arg9[%c1_90, %c0_91, %c0_92] : memref<2x1x256xbf16, #tpu.memory_space<vmem>>, vector<1x1x256xbf16>
    %158 = vector.shape_cast %157 : vector<1x1x256xbf16> to vector<1x256xbf16>
    %159 = arith.extf %158 : vector<1x256xbf16> to vector<1x256xf32>
    %160 = vector.broadcast %159 : vector<1x256xf32> to vector<8x256xf32>
    %161 = arith.mulf %156, %160 : vector<8x256xf32>
    %cst_93 = arith.constant dense<0.000000e+00> : vector<8xf32>
    %162 = vector.multi_reduction <add>, %161, %cst_93 [1] : vector<8x256xf32> to vector<8xf32>
    %163 = vector.shape_cast %162 : vector<8xf32> to vector<8x1xf32>
    %c1_94 = arith.constant 1 : index
    %c0_95 = arith.constant 0 : index
    %c0_96 = arith.constant 0 : index
    %164 = vector.load %arg10[%c1_94, %c0_95, %c0_96] : memref<2x1x1xf32, #tpu.memory_space<vmem>>, vector<1x1x1xf32>
    %165 = vector.shape_cast %164 : vector<1x1x1xf32> to vector<1x1xf32>
    %166 = vector.broadcast %165 : vector<1x1xf32> to vector<8x1xf32>
    %167 = arith.addf %163, %166 : vector<8x1xf32>
    %168 = vector.shape_cast %167 : vector<8x1xf32> to vector<8xf32>
    %c1_97 = arith.constant 1 : index
    %c0_98 = arith.constant 0 : index
    %169 = vector.load %arg11[%c1_97, %c0_98] : memref<2x8xf32, #tpu.memory_space<vmem>>, vector<1x8xf32>
    %170 = vector.shape_cast %169 : vector<1x8xf32> to vector<8xf32>
    %171 = vector.shape_cast %168 : vector<8xf32> to vector<1x8xf32>
    tpu.vector_store %arg11[%c1_97, %c0_98], %171 {strides = array<i32>} : memref<2x8xf32, #tpu.memory_space<vmem>>, vector<1x8xf32>,
    return
  }
}

</mosaic_0001>

<bundles_post_ra>
// kernel: critic_forward.1
= control target key start
LH: loop header
LB: loop body
LE: loop exit
PB: predicated region body
PF: predicated region fallthrough
CT: control target
= control target key end

     0   :  { %16 = vsyncpa [#allocation3], 0  ;;  %s2270_s0 = inlined_call_operand.vmem [shape: f32[8,17], index: 0, kind: input, shape index: {}]   ;;  %s2271_s1 = inlined_call_operand.vmem [shape: f32[8,6], index: 1, kind: input, shape index: {}]   ;;  %s2272_s2 = inlined_call_operand.vmem [shape: bf16[2,17,256], index: 2, kind: input, shape index: {}]   ;;  %s2273_s3 = inlined_call_operand.vmem [shape: bf16[2,6,256], index: 3, kind: input, shape index: {}]   ;;  %s2274_s4 = inlined_call_operand.vmem [shape: f32[2,1,256], index: 4, kind: input, shape index: {}]   ;;  %s2275_s5 = inlined_call_operand.hbm [shape: bf16[2,256,256], index: 5, kind: input, shape index: {}]   ;;  %s2276_s6 = inlined_call_operand.vmem [shape: f32[2,1,256], index: 6, kind: input, shape index: {}]   ;;  %s2277_s7 = inlined_call_operand.hbm [shape: bf16[2,256,256], index: 7, kind: input, shape index: {}]   ;;  %s2278_s8 = inlined_call_operand.vmem [shape: f32[2,1,256], index: 8, kind: input, shape index: {}]   ;;  %s2279_s9 = inlined_call_operand.vmem [shape: bf16[2,1,256], index: 9, kind: input, shape index: {}]   ;;  %s2280_s10 = inlined_call_operand.vmem [shape: f32[2,1,1], index: 10, kind: input, shape index: {}]   ;;  %s2281_s11 = inlined_call_operand.vmem [shape: f32[2,8], index: 11, kind: output, shape index: {}]  }
   0x1   :  { %17 = vsyncpa [#allocation5], 0  ;;  %s2039_s17 = smov [#allocation2]   ;;  %s1991_s21 = scalar_lea.hbm %s2275_s5, 8192 }
   0x2   :  { %s33_s18 = sshll.u32 %s2039_s17, 4  ;;  %p1992_p0 = scmp.ne.s32.totalorder %s2275_s5, %s1991_s21  ;;  %s34_s18 = int_to_ptr.vmem [resolvable:$true] %s33_s18 }
   0x3   :  { %p1995_p1 = scmp.lt.u32.totalorder %s1991_s21, %s2275_s5 }
   0x5   :  { %p1997_p2 = pnand %p1995_p1, %p1992_p0 }
   0x7   :  { %2000 = shalt.err (!%p1997_p2)
}
   0x8   :  { %s2001_s26 = scalar_lea.vmem %s34_s18, 8192  ;;  %p2006_p4 = scmp.lt.s32.totalorder %s34_s18, %s34_s18 }
   0x9   :  { %p2002_p3 = scmp.ne.s32.totalorder %s34_s18, %s2001_s26  ;;  %p2007_p5 = scmp.lt.s32.totalorder %s2001_s26, %s2001_s26 }
   0xb   :  { %p2008_p6 = por %p2007_p5, %p2006_p4 }
   0xd   :  { %p2009_p7 = pnand %p2008_p6, %p2002_p3 }
   0xf   :  { %2012 = shalt.err (!%p2009_p7)
}
  0x10   :  { %s2040_s27 = smov 128   ;;  %s2041_s28 = smov 8  }
  0x11   :  { %39 = dma.hbm_to_vmem [thread:$0]  %s2275_s5, 8192, %s34_s18, [#allocation3], %s2040_s27, %s2040_s27, %s2041_s28  }
  0x12   :  { %s2042_s12 = smov [#allocation4]   ;;  %s2013_s16 = scalar_lea.hbm %s2277_s7, 8192 }
  0x13   :  { %s47_s13 = sshll.u32 %s2042_s12, 4  ;;  %p2014_p8 = scmp.ne.s32.totalorder %s2277_s7, %s2013_s16  ;;  %s48_s13 = int_to_ptr.vmem [resolvable:$true] %s47_s13 }
  0x14   :  { %p2017_p9 = scmp.lt.u32.totalorder %s2013_s16, %s2277_s7 }
  0x16   :  { %p2019_p10 = pnand %p2017_p9, %p2014_p8 }
  0x18   :  { %2022 = shalt.err (!%p2019_p10)
}
  0x19   :  { %s2023_s22 = scalar_lea.vmem %s48_s13, 8192  ;;  %p2028_p12 = scmp.lt.s32.totalorder %s48_s13, %s48_s13 }
  0x1a   :  { %p2024_p11 = scmp.ne.s32.totalorder %s48_s13, %s2023_s22  ;;  %p2029_p13 = scmp.lt.s32.totalorder %s2023_s22, %s2023_s22 }
  0x1c   :  { %p2030_p0 = por %p2029_p13, %p2028_p12 }
  0x1e   :  { %p2031_p1 = pnand %p2030_p0, %p2024_p11 }
  0x20   :  { %2034 = shalt.err (!%p2031_p1)
}
  0x21   :  { %53 = dma.hbm_to_vmem [thread:$0]  %s2277_s7, 8192, %s48_s13, [#allocation5], %s2040_s27, %s2040_s27, %s2041_s28  }
  0x22   :  { %2035 = dma.done.wait [#allocation3], 8192  }
  0x23   :  { %2036 = vsyncadd [#allocation3], 4294959104 }
  0x24   :  { %2037 = dma.done.wait [#allocation5], 8192  }
  0x25   :  { %2038 = vsyncadd [#allocation5], 4294959104  ;;  %v2043_v0 = vmov 0   ;;  %vm151_vm0 = vcmask 1040384   ;;  %v1737_v1 = vld [vmem:[%s2272_s2 + $0x4] ss:$8 sps:$4 sm:$0xff]   ;;  %v203_v61 = vlaneseq }
  0x26   :  { %123 = vmatprep.mubr.bf16.mxu0 %v2043_v0  ;;  %192 = vmatprep.mubr.bf16.mxu1 %v2043_v0  ;;  %vm84_vm1 = vcmask 1042432   ;;  %v2136_v2 = vsel %vm151_vm0, 65535, %v2043_v0  ;;  %v74_v3 = vld [vmem:[%s2273_s3] sm:$0x77]  ;;  %v73_v5 = vld [vmem:[%s2272_s2 + $0x10] sm:$0x11] }
  0x27   :  { %1735 = vset.pattern.permute.xlu1 %v2043_v0  ;;  %1736 = vset.pattern.permute.xlu0 %v2043_v0  ;;  %v1740_v4 = vld [vmem:[%s2272_s2] ss:$8 sps:$4 sm:$0xff]   ;;  %v1574_v6 = vcombine.high %v74_v3, %v74_v3  ;;  %v1573_v7 = vcombine.low %v74_v3, %v74_v3  ;;  %v1580_v8 = vcombine.high %v73_v5, %v73_v5  ;;  %v1746_v12 = vld [vmem:[#allocation2 + $0x4] ss:$8 sps:$4 sm:$0xff]   ;;  %vm80_vm2 = vcmask 48128  }
  0x28   :  { %160 = vmatprep.subr.bf16.mxu1 %v1737_v1  ;;  %v69_v9 = vld [vmem:[%s2271_s1] sm:$0xff]  ;;  %v1579_v10 = vcombine.low %v73_v5, %v73_v5  ;;  %v1749_v19 = vld [vmem:[#allocation2 + $0x14] ss:$8 sps:$4 sm:$0xff]   ;;  %vm147_vm3 = vcmask 138240   ;;  %v1747_v20 = vld [vmem:[#allocation2 + $0x10] ss:$8 sps:$4 sm:$0xff]  }
  0x29   :  { %161 = vmatpush1.bf16.msra.mxu1 %v1740_v4  ;;  %v67_v11 = vld [vmem:[%s2270_s0] sm:$0xff]  ;;  %1575 = vmatprep.subr.msk.bf16.mxu0 %vm84_vm1, %v1574_v6  ;;  %v86_v13 = vsel %vm84_vm1, %v1573_v7, 0  ;;  %v158_v14 = vand.u32 %v1580_v8, %v2136_v2  ;;  %v2156_v15 = vpack.c.bf16 %v69_v9, %v69_v9  ;;  %v1755_v23 = vld [vmem:[#allocation2 + $0x34] ss:$8 sps:$4 sm:$0xff]   ;;  %v1753_v24 = vld [vmem:[#allocation2 + $0x30] ss:$8 sps:$4 sm:$0xff]  }
  0x2a   :  { %v155_v16 = vand.u32 %v1579_v10, %v2136_v2  ;;  %92 = vmatpush1.bf16.msra.mxu0 %v86_v13  ;;  %v1744_v17 = vld [vmem:[#allocation2] ss:$8 sps:$4 sm:$0xff]   ;;  %v2159_v18 = vpack.c.bf16 %v67_v11, %v67_v11  ;;  %v1752_v21 = vld [vmem:[#allocation2 + $0x24] ss:$8 sps:$4 sm:$0xff]   ;;  %v1761_v27 = vld [vmem:[#allocation2 + $0x54] ss:$8 sps:$4 sm:$0xff]  }
  0x2b   :  { %162 = vmatprep.subr.bf16.mxu1 %v158_v14  ;;  %443 = vmatprep.subr.bf16.mxu0 %v1746_v12  ;;  %v1750_v22 = vld [vmem:[#allocation2 + $0x20] ss:$8 sps:$4 sm:$0xff]   ;;  %v1758_v25 = vld [vmem:[#allocation2 + $0x44] ss:$8 sps:$4 sm:$0xff]   ;;  %v1759_v28 = vld [vmem:[#allocation2 + $0x50] ss:$8 sps:$4 sm:$0xff]  }
  0x2c   :  { %v1756_v26 = vld [vmem:[#allocation2 + $0x40] ss:$8 sps:$4 sm:$0xff]   ;;  %v1764_v29 = vld [vmem:[#allocation2 + $0x64] ss:$8 sps:$4 sm:$0xff]   ;;  %v1767_v31 = vld [vmem:[#allocation2 + $0x74] ss:$8 sps:$4 sm:$0xff]  }
  0x2d   :  { %163 = vmatpush1.bf16.msra.mxu1 %v155_v16  ;;  %1576 = vmatmul.mubr.msk.bf16.vlgmr.msra.gmra.mrb[0].mxu0 %vm80_vm2, %v2156_v15  ;;  %v1762_v30 = vld [vmem:[#allocation2 + $0x60] ss:$8 sps:$4 sm:$0xff]   ;;  %v1765_v32 = vld [vmem:[#allocation2 + $0x70] ss:$8 sps:$4 sm:$0xff]   ;;  %v1770_v33 = vld [vmem:[#allocation2 + $0x84] ss:$8 sps:$4 sm:$0xff]  }
  0x2e   :  { %444 = vmatpush1.bf16.msra.mxu0 %v1744_v17  ;;  %v1768_v34 = vld [vmem:[#allocation2 + $0x80] ss:$8 sps:$4 sm:$0xff]   ;;  %v1773_v35 = vld [vmem:[#allocation2 + $0x94] ss:$8 sps:$4 sm:$0xff]   ;;  %v1771_v36 = vld [vmem:[#allocation2 + $0x90] ss:$8 sps:$4 sm:$0xff]  }
  0x2f   :  { %445 = vmatprep.subr.bf16.mxu0 %v1749_v19  ;;  %v1776_v37 = vld [vmem:[#allocation2 + $0xa4] ss:$8 sps:$4 sm:$0xff]   ;;  %v1774_v38 = vld [vmem:[#allocation2 + $0xa0] ss:$8 sps:$4 sm:$0xff]   ;;  %v1779_v39 = vld [vmem:[#allocation2 + $0xb4] ss:$8 sps:$4 sm:$0xff]  }
  0x30   :  { %1581 = vmatmul.mubr.msk.bf16.vlgmr.msra.gmra.mrb[0].mxu1 %vm147_vm3, %v2159_v18  ;;  %v1777_v40 = vld [vmem:[#allocation2 + $0xb0] ss:$8 sps:$4 sm:$0xff]   ;;  %v1782_v41 = vld [vmem:[#allocation2 + $0xc4] ss:$8 sps:$4 sm:$0xff]   ;;  %v1780_v42 = vld [vmem:[#allocation2 + $0xc0] ss:$8 sps:$4 sm:$0xff]  }
  0x31   :  { %v1785_v43 = vld [vmem:[#allocation2 + $0xd4] ss:$8 sps:$4 sm:$0xff]   ;;  %v1783_v44 = vld [vmem:[#allocation2 + $0xd0] ss:$8 sps:$4 sm:$0xff]   ;;  %v1788_v45 = vld [vmem:[#allocation2 + $0xe4] ss:$8 sps:$4 sm:$0xff]  }
  0x32   :  { %446 = vmatpush1.bf16.msra.mxu0 %v1747_v20  ;;  %v1786_v46 = vld [vmem:[#allocation2 + $0xe0] ss:$8 sps:$4 sm:$0xff]   ;;  %v1789_v47 = vld [vmem:[#allocation2 + $0xf0] ss:$8 sps:$4 sm:$0xff]   ;;  %v1791_v48 = vld [vmem:[#allocation2 + $0xf4] ss:$8 sps:$4 sm:$0xff]  }
  0x33   :  { %447 = vmatprep.subr.bf16.mxu0 %v1752_v21  ;;  %v1792_v49 = vld [vmem:[#allocation4] ss:$8 sps:$4 sm:$0xff]   ;;  %v1794_v50 = vld [vmem:[#allocation4 + $0x4] ss:$8 sps:$4 sm:$0xff]   ;;  %v1797_v51 = vld [vmem:[#allocation4 + $0x14] ss:$8 sps:$4 sm:$0xff]  }
  0x34   :  { %712 = vmatprep.subr.bf16.mxu1 %v1794_v50  ;;  %v1795_v52 = vld [vmem:[#allocation4 + $0x10] ss:$8 sps:$4 sm:$0xff]   ;;  %v1800_v53 = vld [vmem:[#allocation4 + $0x24] ss:$8 sps:$4 sm:$0xff]   ;;  %v1798_v54 = vld [vmem:[#allocation4 + $0x20] ss:$8 sps:$4 sm:$0xff]  }
  0x35   :  { %713 = vmatpush1.bf16.msra.mxu1 %v1792_v49  ;;  %v1803_v55 = vld [vmem:[#allocation4 + $0x34] ss:$8 sps:$4 sm:$0xff]   ;;  %v1801_v56 = vld [vmem:[#allocation4 + $0x30] ss:$8 sps:$4 sm:$0xff]   ;;  %v1806_v57 = vld [vmem:[#allocation4 + $0x44] ss:$8 sps:$4 sm:$0xff]  }
  0x36   :  { %448 = vmatpush1.bf16.msra.mxu0 %v1750_v22  ;;  %714 = vmatprep.subr.bf16.mxu1 %v1797_v51  ;;  %v1804_v58 = vld [vmem:[#allocation4 + $0x40] ss:$8 sps:$4 sm:$0xff]   ;;  %v1809_v59 = vld [vmem:[#allocation4 + $0x54] ss:$8 sps:$4 sm:$0xff]   ;;  %v1807_v60 = vld [vmem:[#allocation4 + $0x50] ss:$8 sps:$4 sm:$0xff]  }
  0x37   :  { %449 = vmatprep.subr.bf16.mxu0 %v1755_v23  ;;  %v2166_v62 = vshrl.u32 %v203_v61, 7  ;;  %v201_v1 = vld [vmem:[%s2274_s4] sm:$0x3]  ;;  %v1819_v49 = vld [vmem:[#allocation4 + $0x90] ss:$8 sps:$4 sm:$0xff]   ;;  %vm820_vm14 = vcmask 57344  }
  0x38   :  { %v1824_v50 = vld [vmem:[#allocation4 + $0xa4] ss:$8 sps:$4 sm:$0xff]   ;;  %v1822_v51 = vld [vmem:[#allocation4 + $0xa0] ss:$8 sps:$4 sm:$0xff]  }
  0x39   :  { %715 = vmatpush1.bf16.msra.mxu1 %v1795_v52  ;;  %v2169_v63 = vsub.s32 0, %v2166_v62  ;;  %v2175_v3 = vsub.s32 1, %v2166_v62  ;;  %v1827_v52 = vld [vmem:[#allocation4 + $0xb4] ss:$8 sps:$4 sm:$0xff]  }
  0x3a   :  { %450 = vmatpush1.bf16.msra.mxu0 %v1753_v24  ;;  %716 = vmatprep.subr.bf16.mxu1 %v1800_v53  ;;  %v1825_v53 = vld [vmem:[#allocation4 + $0xb0] ss:$8 sps:$4 sm:$0xff]  }
  0x3b   :  { %451 = vmatprep.subr.bf16.mxu0 %v1758_v25  ;;  %v206_v6 = vrot.slane %v201_v1, %v2169_v63  ;;  %v210_v9 = vrot.slane %v201_v1, %v2175_v3  ;;  %v1837_v1 = vld [vmem:[#allocation4 + $0xf0] ss:$8 sps:$4 sm:$0xff]  }
  0x3d   :  { %717 = vmatpush1.bf16.msra.mxu1 %v1798_v54  ;;  %v1830_v54 = vld [vmem:[#allocation4 + $0xc4] ss:$8 sps:$4 sm:$0xff]  }
  0x3e   :  { %452 = vmatpush1.bf16.msra.mxu0 %v1756_v26  ;;  %718 = vmatprep.subr.bf16.mxu1 %v1803_v55  ;;  %v1828_v55 = vld [vmem:[#allocation4 + $0xc0] ss:$8 sps:$4 sm:$0xff]  }
  0x3f   :  { %453 = vmatprep.subr.bf16.mxu0 %v1761_v27 }
  0x41   :  { %719 = vmatpush1.bf16.msra.mxu1 %v1801_v56  ;;  %v1833_v56 = vld [vmem:[#allocation4 + $0xd4] ss:$8 sps:$4 sm:$0xff]  }
  0x42   :  { %454 = vmatpush1.bf16.msra.mxu0 %v1759_v28  ;;  %720 = vmatprep.subr.bf16.mxu1 %v1806_v57  ;;  %v1831_v57 = vld [vmem:[#allocation4 + $0xd0] ss:$8 sps:$4 sm:$0xff]  }
  0x43   :  { %455 = vmatprep.subr.bf16.mxu0 %v1764_v29 }
  0x45   :  { %721 = vmatpush1.bf16.msra.mxu1 %v1804_v58  ;;  %v1836_v58 = vld [vmem:[#allocation4 + $0xe4] ss:$8 sps:$4 sm:$0xff]  }
  0x46   :  { %456 = vmatpush1.bf16.msra.mxu0 %v1762_v30  ;;  %722 = vmatprep.subr.bf16.mxu1 %v1809_v59  ;;  %v1834_v59 = vld [vmem:[#allocation4 + $0xe0] ss:$8 sps:$4 sm:$0xff]  }
  0x47   :  { %457 = vmatprep.subr.bf16.mxu0 %v1767_v31 }
  0x49   :  { %723 = vmatpush1.bf16.msra.mxu1 %v1807_v60  ;;  %v1839_v60 = vld [vmem:[#allocation4 + $0xf4] ss:$8 sps:$4 sm:$0xff]  }
  0x4a   :  { %458 = vmatpush1.bf16.msra.mxu0 %v1765_v32 }
  0x4b   :  { %459 = vmatprep.subr.bf16.mxu0 %v1770_v33 }
  0x4e   :  { %460 = vmatpush1.bf16.msra.mxu0 %v1768_v34 }
  0x4f   :  { %461 = vmatprep.subr.bf16.mxu0 %v1773_v35 }
  0x52   :  { %462 = vmatpush1.bf16.msra.mxu0 %v1771_v36 }
  0x53   :  { %463 = vmatprep.subr.bf16.mxu0 %v1776_v37 }
  0x56   :  { %464 = vmatpush1.bf16.msra.mxu0 %v1774_v38 }
  0x57   :  { %465 = vmatprep.subr.bf16.mxu0 %v1779_v39 }
  0x5a   :  { %466 = vmatpush1.bf16.msra.mxu0 %v1777_v40 }
  0x5b   :  { %467 = vmatprep.subr.bf16.mxu0 %v1782_v41 }
  0x5e   :  { %468 = vmatpush1.bf16.msra.mxu0 %v1780_v42  ;;  %v1812_v42 = vld [vmem:[#allocation4 + $0x64] ss:$8 sps:$4 sm:$0xff]  }
  0x5f   :  { %469 = vmatprep.subr.bf16.mxu0 %v1785_v43  ;;  %v1810_v43 = vld [vmem:[#allocation4 + $0x60] ss:$8 sps:$4 sm:$0xff]   ;;  %724 = vmatprep.subr.bf16.mxu1 %v1812_v42 }
  0x60   :  { %725 = vmatpush1.bf16.msra.mxu1 %v1810_v43 }
  0x62   :  { %470 = vmatpush1.bf16.msra.mxu0 %v1783_v44  ;;  %v1815_v44 = vld [vmem:[#allocation4 + $0x74] ss:$8 sps:$4 sm:$0xff]  }
  0x63   :  { %471 = vmatprep.subr.bf16.mxu0 %v1788_v45  ;;  %v1813_v45 = vld [vmem:[#allocation4 + $0x70] ss:$8 sps:$4 sm:$0xff]   ;;  %726 = vmatprep.subr.bf16.mxu1 %v1815_v44 }
  0x64   :  { %727 = vmatpush1.bf16.msra.mxu1 %v1813_v45 }
  0x66   :  { %472 = vmatpush1.bf16.msra.mxu0 %v1786_v46  ;;  %v1818_v46 = vld [vmem:[#allocation4 + $0x84] ss:$8 sps:$4 sm:$0xff]  }
  0x67   :  { %473 = vmatprep.subr.bf16.mxu0 %v1791_v48  ;;  %728 = vmatprep.subr.bf16.mxu1 %v1818_v46  ;;  %v1821_v48 = vld [vmem:[#allocation4 + $0x94] ss:$8 sps:$4 sm:$0xff]  }
  0x6a   :  { %474 = vmatpush1.bf16.msra.mxu0 %v1789_v47  ;;  %v1816_v47 = vld [vmem:[#allocation4 + $0x80] ss:$8 sps:$4 sm:$0xff]  }
  0x6b   :  { %729 = vmatpush1.bf16.msra.mxu1 %v1816_v47 }
  0x6c   :  { %730 = vmatprep.subr.bf16.mxu1 %v1821_v48  ;;  %v1841_v48 = vld [vmem:[%s2272_s2 + $0x18] ss:$8 sps:$4 sm:$0xff]  }
  0x6f   :  { %731 = vmatpush1.bf16.msra.mxu1 %v1819_v49 }
  0x70   :  { %732 = vmatprep.subr.bf16.mxu1 %v1824_v50 }
  0x73   :  { %733 = vmatpush1.bf16.msra.mxu1 %v1822_v51 }
  0x74   :  { %734 = vmatprep.subr.bf16.mxu1 %v1827_v52 }
  0x77   :  { %735 = vmatpush1.bf16.msra.mxu1 %v1825_v53  ;;  %v1858_v53 = vld [vmem:[#allocation2 + $0x134] ss:$8 sps:$4 sm:$0xff]  }
  0x78   :  { %736 = vmatprep.subr.bf16.mxu1 %v1830_v54  ;;  %v1856_v54 = vld [vmem:[#allocation2 + $0x130] ss:$8 sps:$4 sm:$0xff]  }
  0x7b   :  { %737 = vmatpush1.bf16.msra.mxu1 %v1828_v55  ;;  %v1861_v55 = vld [vmem:[#allocation2 + $0x144] ss:$8 sps:$4 sm:$0xff]  }
  0x7c   :  { %738 = vmatprep.subr.bf16.mxu1 %v1833_v56 }
  0x7f   :  { %739 = vmatpush1.bf16.msra.mxu1 %v1831_v57  ;;  %v1859_v57 = vld [vmem:[#allocation2 + $0x140] ss:$8 sps:$4 sm:$0xff]  }
  0x80   :  { %740 = vmatprep.subr.bf16.mxu1 %v1836_v58 }
  0x83   :  { %741 = vmatpush1.bf16.msra.mxu1 %v1834_v59 }
  0x84   :  { %742 = vmatprep.subr.bf16.mxu1 %v1839_v60  ;;  %v1862_v60 = vld [vmem:[#allocation2 + $0x150] ss:$8 sps:$4 sm:$0xff]  }
  0x87   :  { %743 = vmatpush1.bf16.msra.mxu1 %v1837_v1  ;;  %v1867_v1 = vld [vmem:[#allocation2 + $0x164] ss:$8 sps:$4 sm:$0xff]  }
 0x100   :  { %v125_v4 = vpop.f32.mrb[0].mxu0 }
 0x101   :  { %v127_v5 = vpop.f32.mrb[1].mxu0 }
 0x102   :  { %v129_v7 = vpop.f32.mrb[2].mxu0 }
 0x103   :  { %v194_v8 = vpop.f32.mrb[0].mxu1  ;;  %v130_v10 = vpop.f32.mrb[3].mxu0 }
 0x104   :  { %v195_v11 = vadd.f32 %v194_v8, %v125_v4  ;;  %v196_v12 = vpop.f32.mrb[1].mxu1  ;;  %v1650_v4 = vld [vmem:[%s2273_s3 + $0x8] sm:$0x77] }
 0x105   :  { %v197_v13 = vadd.f32 %v196_v12, %v127_v5  ;;  %v198_v14 = vpop.f32.mrb[2].mxu1  ;;  %v1843_v5 = vld [vmem:[%s2272_s2 + $0x1c] ss:$8 sps:$4 sm:$0xff]   ;;  %v1651_v7 = vcombine.low %v1650_v4, %v1650_v4  ;;  %v1850_v12 = vld [vmem:[#allocation2 + $0x110] ss:$8 sps:$4 sm:$0xff]  }
 0x106   :  { %v213_v16 = vadd.f32 %v206_v6, %v195_v11  ;;  %v199_v17 = vpop.f32.mrb[3].mxu1  ;;  %v1652_v6 = vcombine.high %v1650_v4, %v1650_v4  ;;  %901 = vmatprep.subr.bf16.mxu1 %v1843_v5  ;;  %v1849_v10 = vld [vmem:[#allocation2 + $0x104] ss:$8 sps:$4 sm:$0xff]   ;;  %v1852_v11 = vld [vmem:[#allocation2 + $0x114] ss:$8 sps:$4 sm:$0xff]  }
 0x107   :  { %v214_v19 = vadd.f32 %v210_v9, %v197_v13  ;;  %v834_v8 = vsel %vm84_vm1, %v1651_v7, 0  ;;  %v1847_v9 = vld [vmem:[#allocation2 + $0x100] ss:$8 sps:$4 sm:$0xff]   ;;  %v1855_v13 = vld [vmem:[#allocation2 + $0x124] ss:$8 sps:$4 sm:$0xff]  }
 0x108   :  { %v215_v20 = vmin.f32 %v213_v16, 20.0  ;;  %vm231_vm4 = vcmp.gt.f32.partialorder %v213_v16, 20.0  ;;  %1653 = vmatprep.subr.msk.bf16.mxu0 %vm84_vm1, %v1652_v6  ;;  %v1853_v14 = vld [vmem:[#allocation2 + $0x120] ss:$8 sps:$4 sm:$0xff]   ;;  %v1870_v4 = vld [vmem:[#allocation2 + $0x174] ss:$8 sps:$4 sm:$0xff]  }
 0x109   :  { %v216_v21 = vmin.f32 %v214_v19, 20.0  ;;  %vm232_vm5 = vcmp.gt.f32.partialorder %v214_v19, 20.0  ;;  %v1868_v5 = vld [vmem:[#allocation2 + $0x170] ss:$8 sps:$4 sm:$0xff]   ;;  %v1873_v6 = vld [vmem:[#allocation2 + $0x184] ss:$8 sps:$4 sm:$0xff]  }
 0x10a   :  { %v217_v22 = vmul.f32 1.442695, %v215_v20  ;;  %v1871_v7 = vld [vmem:[#allocation2 + $0x180] ss:$8 sps:$4 sm:$0xff]  }
 0x10b   :  { %v219_v23 = vmul.f32 1.442695, %v216_v21 }
 0x10c   :  { %1943 = vpow2.f32 %v217_v22 }
 0x10d   :  { %1945 = vpow2.f32 %v219_v23 }
 0x116   :  { %v1944_v24 = vpop.eup %1943 }
 0x117   :  { %v1946_v25 = vpop.eup %1945  ;;  %v221_v26 = vadd.f32 2.0, %v1944_v24 }
 0x118   :  { %v222_v27 = vadd.f32 2.0, %v1946_v25 }
 0x119   :  { %v223_v28 = vmul.f32 %v1944_v24, %v221_v26 }
 0x11a   :  { %v224_v29 = vmul.f32 %v1946_v25, %v222_v27 }
 0x11b   :  { %v225_v30 = vadd.f32 2.0, %v223_v28 }
 0x11c   :  { %v226_v31 = vadd.f32 2.0, %v224_v29 }
 0x11d   :  { %1947 = vrcp.f32 %v225_v30 }
 0x11e   :  { %1949 = vrcp.f32 %v226_v31 }
 0x127   :  { %v1948_v32 = vpop.eup %1947 }
 0x128   :  { %v1950_v33 = vpop.eup %1949  ;;  %v228_v34 = vmul.f32 %v1948_v32, %v223_v28 }
 0x129   :  { %v230_v35 = vmul.f32 %v1950_v33, %v224_v29 }
 0x12a   :  { %v233_v36 = vsel %vm231_vm4, 1.0, %v228_v34 }
 0x12b   :  { %v235_v37 = vmul.f32 %v233_v36, %v213_v16  ;;  %v234_v38 = vsel %vm232_vm5, 1.0, %v230_v35  ;;  %v271_v16 = vld [vmem:[%s2276_s6] sm:$0x3] }
 0x12c   :  { %v236_v39 = vmul.f32 %v234_v38, %v214_v19  ;;  %v276_v17 = vrot.slane %v271_v16, %v2169_v63 }
 0x12d   :  { %v237_v41 = vpack.c.bf16 %v235_v37, %v235_v37 }
 0x12e   :  { %v238_v40 = vpack.c.bf16 %v236_v39, %v236_v39 }
 0x130   :  { %475 = vmatprep.mubr.bf16.mxu0 %v238_v40  ;;  %v1649_v40 = vld [vmem:[%s2272_s2 + $0x28] sm:$0x11] }
 0x131   :  { %476 = vmatmul.mubr.bf16.vlgmr.msra.gmra.mrb[4].mxu0 %v237_v41  ;;  %v1658_v45 = vcombine.high %v1649_v40, %v1649_v40  ;;  %v1657_v49 = vcombine.low %v1649_v40, %v1649_v40 }
 0x132   :  { %871 = vmatprep.mubr.bf16.mxu0 %v2043_v0  ;;  %840 = vmatpush1.bf16.msra.mxu0 %v834_v8  ;;  %v1876_v8 = vld [vmem:[#allocation2 + $0x194] ss:$8 sps:$4 sm:$0xff]  }
 0x133   :  { %1187 = vmatprep.subr.bf16.mxu0 %v1849_v10  ;;  %v899_v51 = vand.u32 %v1658_v45, %v2136_v2  ;;  %v896_v52 = vand.u32 %v1657_v49, %v2136_v2  ;;  %v1879_v10 = vld [vmem:[#allocation2 + $0x1a4] ss:$8 sps:$4 sm:$0xff]  }
 0x139   :  { %1654 = vmatmul.mubr.msk.bf16.vlgmr.msra.gmra.mrb[8].mxu0 %vm80_vm2, %v2156_v15  ;;  %v280_v15 = vrot.slane %v271_v16, %v2175_v3  ;;  %v1883_v16 = vld [vmem:[#allocation2 + $0x1c0] ss:$8 sps:$4 sm:$0xff]  }
 0x13a   :  { %1188 = vmatpush1.bf16.msra.mxu0 %v1847_v9  ;;  %v1874_v9 = vld [vmem:[#allocation2 + $0x190] ss:$8 sps:$4 sm:$0xff]  }
 0x13b   :  { %1189 = vmatprep.subr.bf16.mxu0 %v1852_v11  ;;  %v1877_v11 = vld [vmem:[#allocation2 + $0x1a0] ss:$8 sps:$4 sm:$0xff]  }
 0x13e   :  { %1190 = vmatpush1.bf16.msra.mxu0 %v1850_v12  ;;  %v1882_v12 = vld [vmem:[#allocation2 + $0x1b4] ss:$8 sps:$4 sm:$0xff]  }
 0x13f   :  { %1191 = vmatprep.subr.bf16.mxu0 %v1855_v13  ;;  %v1880_v13 = vld [vmem:[#allocation2 + $0x1b0] ss:$8 sps:$4 sm:$0xff]  }
 0x142   :  { %1192 = vmatpush1.bf16.msra.mxu0 %v1853_v14  ;;  %v1885_v14 = vld [vmem:[#allocation2 + $0x1c4] ss:$8 sps:$4 sm:$0xff]  }
 0x143   :  { %1193 = vmatprep.subr.bf16.mxu0 %v1858_v53 }
 0x146   :  { %1194 = vmatpush1.bf16.msra.mxu0 %v1856_v54 }
 0x147   :  { %1195 = vmatprep.subr.bf16.mxu0 %v1861_v55 }
 0x14a   :  { %1196 = vmatpush1.bf16.msra.mxu0 %v1859_v57 }
 0x204   :  { %v477_v19 = vpop.f32.mrb[4].mxu0 }
 0x205   :  { %v478_v20 = vadd.f32 %v477_v19, %v276_v17  ;;  %v479_v21 = vpop.f32.mrb[5].mxu0  ;;  %v1888_v17 = vld [vmem:[#allocation2 + $0x1d4] ss:$8 sps:$4 sm:$0xff]   ;;  %v1891_v19 = vld [vmem:[#allocation2 + $0x1e4] ss:$8 sps:$4 sm:$0xff]  }
 0x206   :  { %v480_v22 = vadd.f32 %v479_v21, %v280_v15  ;;  %v481_v23 = vpop.f32.mrb[6].mxu0  ;;  %v1886_v15 = vld [vmem:[#allocation2 + $0x1d0] ss:$8 sps:$4 sm:$0xff]  }
 0x207   :  { %v484_v24 = vmin.f32 %v478_v20, 20.0  ;;  %v482_v25 = vpop.f32.mrb[7].mxu0  ;;  %vm500_vm6 = vcmp.gt.f32.partialorder %v478_v20, 20.0  ;;  %v1892_v21 = vld [vmem:[#allocation2 + $0x1f0] ss:$8 sps:$4 sm:$0xff]  }
 0x208   :  { %v485_v26 = vmin.f32 %v480_v22, 20.0  ;;  %vm501_vm7 = vcmp.gt.f32.partialorder %v480_v22, 20.0  ;;  %v540_v23 = vld [vmem:[%s2278_s8] sm:$0x3] }
 0x209   :  { %v486_v27 = vmul.f32 1.442695, %v484_v24  ;;  %v545_v24 = vrot.slane %v540_v23, %v2169_v63  ;;  %v549_v25 = vrot.slane %v540_v23, %v2175_v3 }
 0x20a   :  { %v488_v28 = vmul.f32 1.442695, %v485_v26 }
 0x20b   :  { %1951 = vpow2.f32 %v486_v27 }
 0x20c   :  { %1953 = vpow2.f32 %v488_v28  ;;  %v2206_v56 = vpop.f32.mrb[8].mxu0 }
 0x20d   :  { %v2208_v58 = vpop.f32.mrb[9].mxu0 }
 0x20e   :  { %v877_v59 = vpop.f32.mrb[10].mxu0 }
 0x20f   :  { %v878_v2 = vpop.f32.mrb[11].mxu0 }
 0x215   :  { %v1952_v29 = vpop.eup %1951 }
 0x216   :  { %v1954_v30 = vpop.eup %1953  ;;  %v490_v31 = vadd.f32 2.0, %v1952_v29 }
 0x217   :  { %v491_v32 = vadd.f32 2.0, %v1954_v30 }
 0x218   :  { %v492_v33 = vmul.f32 %v1952_v29, %v490_v31 }
 0x219   :  { %v493_v34 = vmul.f32 %v1954_v30, %v491_v32 }
 0x21a   :  { %v494_v35 = vadd.f32 2.0, %v492_v33 }
 0x21b   :  { %v495_v36 = vadd.f32 2.0, %v493_v34 }
 0x21c   :  { %1955 = vrcp.f32 %v494_v35 }
 0x21d   :  { %1957 = vrcp.f32 %v495_v36 }
 0x226   :  { %v1956_v37 = vpop.eup %1955 }
 0x227   :  { %v1958_v38 = vpop.eup %1957  ;;  %v497_v39 = vmul.f32 %v1956_v37, %v492_v33 }
 0x228   :  { %v499_v41 = vmul.f32 %v1958_v38, %v493_v34  ;;  %v1660_v34 = vld [vmem:[%s2274_s4 + $0x2] sm:$0x3] }
 0x229   :  { %v502_v42 = vsel %vm500_vm6, 1.0, %v497_v39  ;;  %v948_v37 = vrot.slane %v1660_v34, %v2169_v63  ;;  %v952_v39 = vrot.slane %v1660_v34, %v2175_v3 }
 0x22a   :  { %v504_v43 = vmul.f32 %v502_v42, %v478_v20  ;;  %v503_v44 = vsel %vm501_vm7, 1.0, %v499_v41  ;;  %v1889_v20 = vld [vmem:[#allocation2 + $0x1e0] ss:$8 sps:$4 sm:$0xff]  }
 0x22b   :  { %v505_v46 = vmul.f32 %v503_v44, %v480_v22  ;;  %v1894_v22 = vld [vmem:[#allocation2 + $0x1f4] ss:$8 sps:$4 sm:$0xff]  }
 0x22c   :  { %v506_v50 = vpack.c.bf16 %v504_v43, %v504_v43 }
 0x22d   :  { %v507_v47 = vpack.c.bf16 %v505_v46, %v505_v46 }
 0x22f   :  { %744 = vmatprep.mubr.bf16.mxu1 %v507_v47 }
 0x230   :  { %745 = vmatmul.mubr.bf16.vlgmr.msra.gmra.mrb[4].mxu1 %v506_v50 }
 0x231   :  { %902 = vmatpush1.bf16.msra.mxu1 %v1841_v48  ;;  %933 = vmatprep.mubr.bf16.mxu1 %v2043_v0  ;;  %v1864_v0 = vld [vmem:[#allocation2 + $0x154] ss:$8 sps:$4 sm:$0xff]  }
 0x232   :  { %903 = vmatprep.subr.bf16.mxu1 %v899_v51  ;;  %1197 = vmatprep.subr.bf16.mxu0 %v1864_v0 }
 0x233   :  { %1198 = vmatpush1.bf16.msra.mxu0 %v1862_v60 }
 0x234   :  { %1199 = vmatprep.subr.bf16.mxu0 %v1867_v1 }
 0x235   :  { %904 = vmatpush1.bf16.msra.mxu1 %v896_v52 }
 0x238   :  { %1659 = vmatmul.mubr.msk.bf16.vlgmr.msra.gmra.mrb[8].mxu1 %vm147_vm3, %v2159_v18  ;;  %v1865_v18 = vld [vmem:[#allocation2 + $0x160] ss:$8 sps:$4 sm:$0xff]  }
 0x239   :  { %1200 = vmatpush1.bf16.msra.mxu0 %v1865_v18  ;;  %v784_v18 = vsub.s32 2, %v2166_v62 }
 0x23a   :  { %1201 = vmatprep.subr.bf16.mxu0 %v1870_v4 }
 0x23d   :  { %1202 = vmatpush1.bf16.msra.mxu0 %v1868_v5 }
 0x23e   :  { %1203 = vmatprep.subr.bf16.mxu0 %v1873_v6 }
 0x241   :  { %1204 = vmatpush1.bf16.msra.mxu0 %v1871_v7 }
 0x242   :  { %1205 = vmatprep.subr.bf16.mxu0 %v1876_v8 }
 0x245   :  { %1206 = vmatpush1.bf16.msra.mxu0 %v1874_v9 }
 0x246   :  { %1207 = vmatprep.subr.bf16.mxu0 %v1879_v10 }
 0x249   :  { %1208 = vmatpush1.bf16.msra.mxu0 %v1877_v11 }
 0x24a   :  { %1209 = vmatprep.subr.bf16.mxu0 %v1882_v12 }
 0x24d   :  { %1210 = vmatpush1.bf16.msra.mxu0 %v1880_v13 }
 0x24e   :  { %1211 = vmatprep.subr.bf16.mxu0 %v1885_v14 }
 0x251   :  { %1212 = vmatpush1.bf16.msra.mxu0 %v1883_v16 }
 0x252   :  { %1213 = vmatprep.subr.bf16.mxu0 %v1888_v17 }
 0x255   :  { %1214 = vmatpush1.bf16.msra.mxu0 %v1886_v15 }
 0x256   :  { %1215 = vmatprep.subr.bf16.mxu0 %v1891_v19 }
 0x259   :  { %1216 = vmatpush1.bf16.msra.mxu0 %v1889_v20 }
 0x25a   :  { %1217 = vmatprep.subr.bf16.mxu0 %v1894_v22 }
 0x25d   :  { %1218 = vmatpush1.bf16.msra.mxu0 %v1892_v21 }
 0x303   :  { %v746_v26 = vpop.f32.mrb[4].mxu1 }
 0x304   :  { %v2215_v27 = vadd.f32 %v746_v26, %v545_v24  ;;  %v748_v28 = vpop.f32.mrb[5].mxu1 }
 0x305   :  { %v749_v29 = vadd.f32 %v748_v28, %v549_v25  ;;  %v750_v30 = vpop.f32.mrb[6].mxu1 }
 0x306   :  { %v753_v31 = vmin.f32 %v2215_v27, 20.0  ;;  %v751_v32 = vpop.f32.mrb[7].mxu1  ;;  %vm769_vm8 = vcmp.gt.f32.partialorder %v2215_v27, 20.0 }
 0x307   :  { %v754_v33 = vmin.f32 %v749_v29, 20.0  ;;  %vm770_vm9 = vcmp.gt.f32.partialorder %v749_v29, 20.0 }
 0x308   :  { %v755_v35 = vmul.f32 1.442695, %v753_v31 }
 0x309   :  { %v757_v36 = vmul.f32 1.442695, %v754_v33 }
 0x30a   :  { %1959 = vpow2.f32 %v755_v35 }
 0x30b   :  { %1961 = vpow2.f32 %v757_v36  ;;  %v935_v38 = vpop.f32.mrb[8].mxu1 }
 0x30c   :  { %v936_v40 = vadd.f32 %v935_v38, %v2206_v56  ;;  %v937_v41 = vpop.f32.mrb[9].mxu1  ;;  %v1898_v38 = vld [vmem:[#allocation4 + $0x110] ss:$8 sps:$4 sm:$0xff]  }
 0x30d   :  { %v938_v42 = vadd.f32 %v937_v41, %v2208_v58  ;;  %v939_v43 = vpop.f32.mrb[10].mxu1  ;;  %v775_v58 = vld [vmem:[%s2279_s9] sm:$0x3]  ;;  %v1906_v41 = vld [vmem:[#allocation4 + $0x134] ss:$8 sps:$4 sm:$0xff]  }
 0x30e   :  { %v955_v44 = vadd.f32 %v948_v37, %v936_v40  ;;  %v940_v45 = vpop.f32.mrb[11].mxu1  ;;  %v776_v1 = vunpack.c.l.bf16 %v775_v58  ;;  %v1900_v37 = vld [vmem:[#allocation4 + $0x114] ss:$8 sps:$4 sm:$0xff]   ;;  %v1901_v40 = vld [vmem:[#allocation4 + $0x120] ss:$8 sps:$4 sm:$0xff]  }
 0x30f   :  { %v956_v46 = vadd.f32 %v952_v39, %v938_v42  ;;  %v1903_v39 = vld [vmem:[#allocation4 + $0x124] ss:$8 sps:$4 sm:$0xff]   ;;  %v1904_v42 = vld [vmem:[#allocation4 + $0x130] ss:$8 sps:$4 sm:$0xff]   ;;  %v1912_v45 = vld [vmem:[#allocation4 + $0x154] ss:$8 sps:$4 sm:$0xff]  }
 0x310   :  { %v957_v47 = vmin.f32 %v955_v44, 20.0  ;;  %v781_v8 = vrot.slane %v776_v1, %v2169_v63  ;;  %v785_v9 = vrot.slane %v776_v1, %v784_v18  ;;  %vm973_vm10 = vcmp.gt.f32.partialorder %v955_v44, 20.0  ;;  %v1909_v43 = vld [vmem:[#allocation4 + $0x144] ss:$8 sps:$4 sm:$0xff]  }
 0x311   :  { %v958_v48 = vmin.f32 %v956_v46, 20.0  ;;  %vm974_vm11 = vcmp.gt.f32.partialorder %v956_v46, 20.0  ;;  %v1933_v58 = vld [vmem:[#allocation4 + $0x1c4] ss:$8 sps:$4 sm:$0xff]  }
 0x312   :  { %v959_v49 = vmul.f32 1.442695, %v957_v47  ;;  %v791_v16 = vrot.slane %v781_v8, %v2169_v63  ;;  %v795_v15 = vrot.slane %v785_v9, %v2169_v63  ;;  %v1915_v47 = vld [vmem:[#allocation4 + $0x164] ss:$8 sps:$4 sm:$0xff]  }
 0x313   :  { %v961_v50 = vmul.f32 1.442695, %v958_v48  ;;  %v1913_v48 = vld [vmem:[#allocation4 + $0x160] ss:$8 sps:$4 sm:$0xff]   ;;  %v1939_v1 = vld [vmem:[#allocation4 + $0x1e4] ss:$8 sps:$4 sm:$0xff]  }
 0x314   :  { %v1960_v51 = vpop.eup %1959  ;;  %1963 = vpow2.f32 %v959_v49  ;;  %v1918_v49 = vld [vmem:[#allocation4 + $0x174] ss:$8 sps:$4 sm:$0xff]  }
 0x315   :  { %v1962_v52 = vpop.eup %1961  ;;  %1965 = vpow2.f32 %v961_v50  ;;  %v759_v53 = vadd.f32 2.0, %v1960_v51  ;;  %v1916_v50 = vld [vmem:[#allocation4 + $0x170] ss:$8 sps:$4 sm:$0xff]  }
 0x316   :  { %v760_v54 = vadd.f32 2.0, %v1962_v52 }
 0x317   :  { %v761_v55 = vmul.f32 %v1960_v51, %v759_v53  ;;  %v1921_v51 = vld [vmem:[#allocation4 + $0x184] ss:$8 sps:$4 sm:$0xff]   ;;  %v1924_v53 = vld [vmem:[#allocation4 + $0x194] ss:$8 sps:$4 sm:$0xff]  }
 0x318   :  { %v762_v57 = vmul.f32 %v1962_v52, %v760_v54  ;;  %v1919_v52 = vld [vmem:[#allocation4 + $0x180] ss:$8 sps:$4 sm:$0xff]   ;;  %v1922_v54 = vld [vmem:[#allocation4 + $0x190] ss:$8 sps:$4 sm:$0xff]  }
 0x319   :  { %v763_v56 = vadd.f32 2.0, %v761_v55 }
 0x31a   :  { %v764_v59 = vadd.f32 2.0, %v762_v57 }
 0x31b   :  { %1967 = vrcp.f32 %v763_v56  ;;  %v1930_v56 = vld [vmem:[#allocation4 + $0x1b4] ss:$8 sps:$4 sm:$0xff]  }
 0x31c   :  { %1969 = vrcp.f32 %v764_v59  ;;  %v1928_v59 = vld [vmem:[#allocation4 + $0x1b0] ss:$8 sps:$4 sm:$0xff]  }
 0x31e   :  { %v1964_v2 = vpop.eup %1963 }
 0x31f   :  { %v1966_v0 = vpop.eup %1965  ;;  %v963_v60 = vadd.f32 2.0, %v1964_v2 }
 0x320   :  { %v964_v4 = vadd.f32 2.0, %v1966_v0 }
 0x321   :  { %v965_v5 = vmul.f32 %v1964_v2, %v963_v60  ;;  %v1931_v2 = vld [vmem:[#allocation4 + $0x1c0] ss:$8 sps:$4 sm:$0xff]   ;;  %v1934_v60 = vld [vmem:[#allocation4 + $0x1d0] ss:$8 sps:$4 sm:$0xff]  }
 0x322   :  { %v966_v6 = vmul.f32 %v1966_v0, %v964_v4  ;;  %v1936_v0 = vld [vmem:[#allocation4 + $0x1d4] ss:$8 sps:$4 sm:$0xff]   ;;  %v1937_v4 = vld [vmem:[#allocation4 + $0x1e0] ss:$8 sps:$4 sm:$0xff]  }
 0x323   :  { %v967_v7 = vadd.f32 2.0, %v965_v5 }
 0x324   :  { %v968_v10 = vadd.f32 2.0, %v966_v6 }
 0x325   :  { %v1968_v11 = vpop.eup %1967  ;;  %1971 = vrcp.f32 %v967_v7  ;;  %v1646_v7 = vld [vmem:[%s2280_s10] ss:$0 sm:$0xff] }
 0x326   :  { %v1970_v12 = vpop.eup %1969  ;;  %v766_v13 = vmul.f32 %v1968_v11, %v761_v55  ;;  %1973 = vrcp.f32 %v968_v10  ;;  %v1927_v55 = vld [vmem:[#allocation4 + $0x1a4] ss:$8 sps:$4 sm:$0xff]   ;;  %v1661_v10 = vld [vmem:[%s2276_s6 + $0x2] sm:$0x3] }
 0x327   :  { %v768_v14 = vmul.f32 %v1970_v12, %v762_v57  ;;  %v1925_v57 = vld [vmem:[#allocation4 + $0x1a0] ss:$8 sps:$4 sm:$0xff]   ;;  %v1020_v11 = vrot.slane %v1661_v10, %v2169_v63  ;;  %v1024_v12 = vrot.slane %v1661_v10, %v2175_v3 }
 0x328   :  { %v771_v17 = vsel %vm769_vm8, 1.0, %v766_v13 }
 0x329   :  { %v772_v19 = vsel %vm770_vm9, 1.0, %v768_v14  ;;  %v773_v20 = vmul.f32 %v771_v17, %v2215_v27  ;;  %v1895_v27 = vld [vmem:[#allocation4 + $0x100] ss:$8 sps:$4 sm:$0xff]  }
 0x32a   :  { %v774_v21 = vmul.f32 %v772_v19, %v749_v29  ;;  %v1897_v29 = vld [vmem:[#allocation4 + $0x104] ss:$8 sps:$4 sm:$0xff]  }
 0x32b   :  { %v796_v22 = vmul.f32 %v791_v16, %v773_v20  ;;  %1458 = vmatprep.subr.bf16.mxu1 %v1897_v29 }
 0x32c   :  { %v797_v23 = vmul.f32 %v795_v15, %v774_v21  ;;  %1459 = vmatpush1.bf16.msra.mxu1 %v1895_v27 }
 0x32d   :  { %1460 = vmatprep.subr.bf16.mxu1 %v1900_v37 }
 0x32e   :  { %v798_v24 = vadd.f32 %v797_v23, %v796_v22 }
 0x32f   :  { %v1972_v25 = vpop.eup %1971 }
 0x330   :  { %v1974_v26 = vpop.eup %1973  ;;  %v970_v28 = vmul.f32 %v1972_v25, %v965_v5  ;;  %799 = vadd.xlane.f32.xlu0 %v798_v24  ;;  %1461 = vmatpush1.bf16.msra.mxu1 %v1898_v38  ;;  %v1942_v5 = vld [vmem:[#allocation4 + $0x1f4] ss:$8 sps:$4 sm:$0xff]  }
 0x331   :  { %v972_v30 = vmul.f32 %v1974_v26, %v966_v6  ;;  %1462 = vmatprep.subr.bf16.mxu1 %v1903_v39  ;;  %v1940_v6 = vld [vmem:[#allocation4 + $0x1f0] ss:$8 sps:$4 sm:$0xff]  }
 0x332   :  { %v975_v31 = vsel %vm973_vm10, 1.0, %v970_v28 }
 0x333   :  { %v977_v32 = vmul.f32 %v975_v31, %v955_v44  ;;  %v976_v33 = vsel %vm974_vm11, 1.0, %v972_v30  ;;  %v1907_v44 = vld [vmem:[#allocation4 + $0x140] ss:$8 sps:$4 sm:$0xff]  }
 0x334   :  { %v978_v34 = vmul.f32 %v976_v33, %v956_v46  ;;  %1463 = vmatpush1.bf16.msra.mxu1 %v1901_v40  ;;  %v1910_v46 = vld [vmem:[#allocation4 + $0x150] ss:$8 sps:$4 sm:$0xff]  }
 0x335   :  { %v979_v36 = vpack.c.bf16 %v977_v32, %v977_v32  ;;  %1464 = vmatprep.subr.bf16.mxu1 %v1906_v41 }
 0x336   :  { %v980_v35 = vpack.c.bf16 %v978_v34, %v978_v34 }
 0x338   :  { %1219 = vmatprep.mubr.bf16.mxu0 %v980_v35  ;;  %1465 = vmatpush1.bf16.msra.mxu1 %v1904_v42  ;;  %v814_v42 = vand.u32 127, %v203_v61 }
 0x339   :  { %1220 = vmatmul.mubr.bf16.vlgmr.msra.gmra.mrb[12].mxu0 %v979_v36  ;;  %1466 = vmatprep.subr.bf16.mxu1 %v1909_v43 }
 0x33a   :  { %v817_v43 = vsub.s32 %v814_v42, %v2166_v62  ;;  %v1729_v62 = vld [vmem:[%s2280_s10 + $0x1] ss:$0 sm:$0xff] }
 0x33c   :  { %1467 = vmatpush1.bf16.msra.mxu1 %v1907_v44 }
 0x33d   :  { %1468 = vmatprep.subr.bf16.mxu1 %v1912_v45 }
 0x340   :  { %1469 = vmatpush1.bf16.msra.mxu1 %v1910_v46  ;;  %v1694_v46 = vld [vmem:[%s2278_s8 + $0x2] sm:$0x3] }
 0x341   :  { %1470 = vmatprep.subr.bf16.mxu1 %v1915_v47  ;;  %v1291_v47 = vrot.slane %v1694_v46, %v2169_v63 }
 0x344   :  { %1471 = vmatpush1.bf16.msra.mxu1 %v1913_v48  ;;  %v1295_v48 = vrot.slane %v1694_v46, %v2175_v3 }
 0x345   :  { %1472 = vmatprep.subr.bf16.mxu1 %v1918_v49 }
 0x348   :  { %1473 = vmatpush1.bf16.msra.mxu1 %v1916_v50 }
 0x349   :  { %1474 = vmatprep.subr.bf16.mxu1 %v1921_v51 }
 0x34c   :  { %1475 = vmatpush1.bf16.msra.mxu1 %v1919_v52 }
 0x34d   :  { %1476 = vmatprep.subr.bf16.mxu1 %v1924_v53 }
 0x350   :  { %1477 = vmatpush1.bf16.msra.mxu1 %v1922_v54 }
 0x351   :  { %1478 = vmatprep.subr.bf16.mxu1 %v1927_v55 }
 0x354   :  { %1479 = vmatpush1.bf16.msra.mxu1 %v1925_v57 }
 0x355   :  { %1480 = vmatprep.subr.bf16.mxu1 %v1930_v56 }
 0x358   :  { %1481 = vmatpush1.bf16.msra.mxu1 %v1928_v59 }
 0x359   :  { %1482 = vmatprep.subr.bf16.mxu1 %v1933_v58 }
 0x35c   :  { %1483 = vmatpush1.bf16.msra.mxu1 %v1931_v2 }
 0x35d   :  { %1484 = vmatprep.subr.bf16.mxu1 %v1936_v0 }
 0x360   :  { %1485 = vmatpush1.bf16.msra.mxu1 %v1934_v60 }
 0x361   :  { %1486 = vmatprep.subr.bf16.mxu1 %v1939_v1 }
 0x364   :  { %1487 = vmatpush1.bf16.msra.mxu1 %v1937_v4 }
 0x365   :  { %1488 = vmatprep.subr.bf16.mxu1 %v1942_v5  ;;  %v1727_v5 = vld [vmem:[%s2279_s9 + $0x2] sm:$0x3] }
 0x368   :  { %1489 = vmatpush1.bf16.msra.mxu1 %v1940_v6  ;;  %v1523_v6 = vunpack.c.l.bf16 %v1727_v5 }
 0x3bd   :  { %v800_v8 = vpop.xlane.xlu0 %799 }
 0x3be   :  { %v808_v9 = vadd.f32 %v1646_v7, %v800_v8  ;;  %v1528_v7 = vrot.slane %v1523_v6, %v2169_v63  ;;  %v1532_v8 = vrot.slane %v1523_v6, %v784_v18 }
 0x3c0   :  { %811 = vperm.xlu1 %1735, %v808_v9  }
 0x40c   :  { %v1221_v13 = vpop.f32.mrb[12].mxu0 }
 0x40d   :  { %v1222_v14 = vadd.f32 %v1221_v13, %v1020_v11  ;;  %v1223_v16 = vpop.f32.mrb[13].mxu0  ;;  %v1538_v13 = vrot.slane %v1528_v7, %v2169_v63 }
 0x40e   :  { %v1224_v17 = vadd.f32 %v1223_v16, %v1024_v12  ;;  %v1225_v15 = vpop.f32.mrb[14].mxu0  ;;  %v1542_v16 = vrot.slane %v1532_v8, %v2169_v63 }
 0x40f   :  { %v1228_v19 = vmin.f32 %v1222_v14, 20.0  ;;  %v1226_v20 = vpop.f32.mrb[15].mxu0  ;;  %vm1244_vm12 = vcmp.gt.f32.partialorder %v1222_v14, 20.0 }
 0x410   :  { %v1229_v21 = vmin.f32 %v1224_v17, 20.0  ;;  %vm1245_vm13 = vcmp.gt.f32.partialorder %v1224_v17, 20.0 }
 0x411   :  { %v1230_v22 = vmul.f32 1.442695, %v1228_v19 }
 0x412   :  { %v1232_v23 = vmul.f32 1.442695, %v1229_v21 }
 0x413   :  { %1975 = vpow2.f32 %v1230_v22 }
 0x414   :  { %1977 = vpow2.f32 %v1232_v23 }
 0x41d   :  { %v1976_v24 = vpop.eup %1975 }
 0x41e   :  { %v1978_v25 = vpop.eup %1977  ;;  %v1234_v26 = vadd.f32 2.0, %v1976_v24 }
 0x41f   :  { %v1235_v28 = vadd.f32 2.0, %v1978_v25 }
 0x420   :  { %v1236_v30 = vmul.f32 %v1976_v24, %v1234_v26 }
 0x421   :  { %v1237_v31 = vmul.f32 %v1978_v25, %v1235_v28 }
 0x422   :  { %v1238_v32 = vadd.f32 2.0, %v1236_v30 }
 0x423   :  { %v1239_v33 = vadd.f32 2.0, %v1237_v31 }
 0x424   :  { %1979 = vrcp.f32 %v1238_v32 }
 0x425   :  { %1981 = vrcp.f32 %v1239_v33 }
 0x42e   :  { %v1980_v34 = vpop.eup %1979 }
 0x42f   :  { %v1982_v35 = vpop.eup %1981  ;;  %v1241_v36 = vmul.f32 %v1980_v34, %v1236_v30 }
 0x430   :  { %v1243_v27 = vmul.f32 %v1982_v35, %v1237_v31 }
 0x431   :  { %v1246_v29 = vsel %vm1244_vm12, 1.0, %v1241_v36 }
 0x432   :  { %v1248_v37 = vmul.f32 %v1246_v29, %v1222_v14  ;;  %v1247_v38 = vsel %vm1245_vm13, 1.0, %v1243_v27 }
 0x433   :  { %v1249_v39 = vmul.f32 %v1247_v38, %v1224_v17 }
 0x434   :  { %v1250_v41 = vpack.c.bf16 %v1248_v37, %v1248_v37 }
 0x435   :  { %v1251_v40 = vpack.c.bf16 %v1249_v39, %v1249_v39 }
 0x437   :  { %1490 = vmatprep.mubr.bf16.mxu1 %v1251_v40 }
 0x438   :  { %1491 = vmatmul.mubr.bf16.vlgmr.msra.gmra.mrb[12].mxu1 %v1250_v41 }
 0x43f   :  { %v812_v44 = vpop.permute.xlu1 %811 }
 0x440   :  { %v818_v45 = vrot.slane %v812_v44, %v817_v43 }
 0x442   :  { %821 = vst.msk [vmem:[%s2281_s11] sm:$0x1] %vm820_vm14, %v818_v45 }
 0x50b   :  { %v1492_v49 = vpop.f32.mrb[12].mxu1 }
 0x50c   :  { %v1493_v61 = vadd.f32 %v1492_v49, %v1291_v47  ;;  %v1494_v50 = vpop.f32.mrb[13].mxu1 }
 0x50d   :  { %v1495_v51 = vadd.f32 %v1494_v50, %v1295_v48  ;;  %v1496_v52 = vpop.f32.mrb[14].mxu1 }
 0x50e   :  { %v1499_v53 = vmin.f32 %v1493_v61, 20.0  ;;  %v1497_v54 = vpop.f32.mrb[15].mxu1  ;;  %vm1515_vm15 = vcmp.gt.f32.partialorder %v1493_v61, 20.0 }
 0x50f   :  { %v1500_v55 = vmin.f32 %v1495_v51, 20.0  ;;  %vm1516_vm0 = vcmp.gt.f32.partialorder %v1495_v51, 20.0 }
 0x510   :  { %v1501_v57 = vmul.f32 1.442695, %v1499_v53 }
 0x511   :  { %v1503_v56 = vmul.f32 1.442695, %v1500_v55 }
 0x512   :  { %1983 = vpow2.f32 %v1501_v57 }
 0x513   :  { %1985 = vpow2.f32 %v1503_v56 }
 0x51c   :  { %v1984_v59 = vpop.eup %1983 }
 0x51d   :  { %v1986_v58 = vpop.eup %1985  ;;  %v1505_v2 = vadd.f32 2.0, %v1984_v59 }
 0x51e   :  { %v1506_v0 = vadd.f32 2.0, %v1986_v58 }
 0x51f   :  { %v1507_v60 = vmul.f32 %v1984_v59, %v1505_v2 }
 0x520   :  { %v1508_v1 = vmul.f32 %v1986_v58, %v1506_v0 }
 0x521   :  { %v1509_v4 = vadd.f32 2.0, %v1507_v60 }
 0x522   :  { %v1510_v3 = vadd.f32 2.0, %v1508_v1 }
 0x523   :  { %1987 = vrcp.f32 %v1509_v4 }
 0x524   :  { %1989 = vrcp.f32 %v1510_v3 }
 0x52d   :  { %v1988_v9 = vpop.eup %1987 }
 0x52e   :  { %v1990_v10 = vpop.eup %1989  ;;  %v1512_v11 = vmul.f32 %v1988_v9, %v1507_v60 }
 0x52f   :  { %v1514_v12 = vmul.f32 %v1990_v10, %v1508_v1 }
 0x530   :  { %v1517_v14 = vsel %vm1515_vm15, 1.0, %v1512_v11 }
 0x531   :  { %v1519_v17 = vmul.f32 %v1517_v14, %v1493_v61  ;;  %v1518_v15 = vsel %vm1516_vm0, 1.0, %v1514_v12 }
 0x532   :  { %v1520_v19 = vmul.f32 %v1518_v15, %v1495_v51 }
 0x533   :  { %v1543_v20 = vmul.f32 %v1538_v13, %v1519_v17 }
 0x534   :  { %v1544_v21 = vmul.f32 %v1542_v16, %v1520_v19 }
 0x536   :  { %v1545_v22 = vadd.f32 %v1544_v21, %v1543_v20 }
 0x538   :  { %1546 = vadd.xlane.f32.xlu0 %v1545_v22 }
 0x5c5   :  { %v1547_v18 = vpop.xlane.xlu0 %1546 }
 0x5c6   :  { %v1556_v23 = vadd.f32 %v1729_v62, %v1547_v18 }
 0x5c8   :  { %1559 = vperm.xlu1 %1735, %v1556_v23  }
 0x647   :  { %v1560_v24 = vpop.permute.xlu1 %1559 }
 0x648   :  { %v1564_v25 = vrot.slane %v1560_v24, %v817_v43 }
 0x64a   :  { %1566 = vst.msk [vmem:[%s2281_s11 + $0x1] sm:$0x1] %vm820_vm14, %v1564_v25 }
 0x64b   :  { %1571 = vsyncpa [#allocation3], 1 }
 0x64c   :  { %1572 = vsyncpa [#allocation5], 1 }

</bundles_post_ra>
